<compile_context>
chip_gen: v5e
topology: v5e:2x2
jax: 0.10.0
libtpu: 0.0.40
codegen_flags: <defaults>
</compile_context>

<pallas_src>
import numpy as np
import jax
import jax.numpy as jnp
from jax.experimental import pallas as pl
from jax.experimental.pallas import tpu as pltpu

FILTER_LEN = 2  # haar

# pywt 'haar' decomposition filters, flipped exactly as in the PyTorch __init__.
_S = np.float32(1.0 / np.sqrt(2.0))
DEC_LO = np.array([_S, _S], dtype=np.float32)    # dec_lo flipped
DEC_HI = np.array([_S, -_S], dtype=np.float32)   # dec_hi ([-s, s]) flipped

_ACT_VMEM_CAP = 8 * 1024 * 1024   # max bytes for a single-tile fused matrix


def _get_pad(data_len: int, filter_len: int):
    """Identical to WaveletTransform2D.get_pad: returns (padr, padl); the +1 for
    odd sizes is on the FIRST value."""
    padr = (2 * filter_len - 3) // 2
    padl = (2 * filter_len - 3) // 2
    if data_len % 2 != 0:
        padr += 1
    return padr, padl


def _fused_haar_matrix(wp: int, wo: int) -> np.ndarray:
    """(2*wp, 4*wo) +-0.5 matrix.

    Row block p*wp corresponds to input row parity p (even/odd image row), the
    lane within a block is the (padded) image column.  Column blocks are
    LL | LH | HL | HH in the module's order.  The exact Haar scale is folded in
    (0.5 is a power of two, bit-equivalent to (1/sqrt2)^2 up to f32 rounding of
    the reference filters)."""
    f = np.zeros((2 * wp, 4 * wo), dtype=np.float32)
    j = np.arange(wo)
    lo = np.array([1.0, 1.0], dtype=np.float32)
    hi = np.array([1.0, -1.0], dtype=np.float32)
    # (fh, fw): fh along height (row parity), fw along width — module order.
    for s, (fh, fw) in enumerate(((lo, lo), (hi, lo), (lo, hi), (hi, hi))):
        for p in range(2):
            for q in range(2):
                f[p * wp + 2 * j + q, s * wo + j] = 0.5 * fh[p] * fw[q]
    return f


def _vmem_capacity_bytes() -> int:
    try:
        return int(pltpu.get_tpu_info().vmem_capacity_bytes)
    except Exception:
        return 64 * 1024 * 1024   # conservative (v7x-sized) fallback


def _pick_tm(m: int, tw: int, itemsize: int, budget_bytes: int) -> int:
    """Rows of the flattened (M, 2*Wp) input processed per grid step."""
    if m <= 8:
        return m                                    # block dim == full dim is legal
    # Per-row VMEM: double-buffered input (2*tw) + double-buffered outputs
    # (4 * tw/2) in the I/O dtype, plus the f32 matmul result temporary.
    per_row = 4 * itemsize * (2 * tw) + 4 * (2 * tw)
    tm_budget = max(8, (budget_bytes // max(per_row, 1)) // 8 * 8)
    # Keep >= 8 grid steps when the problem is big enough (pipeline depth and
    # the "parallel" split across v7x's two TensorCores).
    tm_steps = max(8, ((m // 8) // 8) * 8) if m >= 64 else 8
    return max(8, min(tm_budget, tm_steps, 1024))


# ---------------------------------------------------------------------------
# Kernel: one fused MXU matmul -> four lane-contiguous subband stores.
# ---------------------------------------------------------------------------
def _dwt_kernel(*refs):
    *x_parts, f_ref, ll_ref, lh_ref, hl_ref, hh_ref = refs
    if len(x_parts) == 1:
        x = x_parts[0][...]                          # (TM, 2*Wp) — full width
    else:
        # Width-tiled path: even-row / odd-row lane halves of this width tile.
        x = jnp.concatenate([x_parts[0][...], x_parts[1][...]], axis=-1)
    r = jnp.dot(x, f_ref[...], preferred_element_type=jnp.float32)  # (TM, 4*Wo_t)
    wo = ll_ref.shape[-1]
    ll_ref[...] = r[:, 0 * wo:1 * wo].astype(ll_ref.dtype)
    lh_ref[...] = r[:, 1 * wo:2 * wo].astype(lh_ref.dtype)
    hl_ref[...] = r[:, 2 * wo:3 * wo].astype(hl_ref.dtype)
    hh_ref[...] = r[:, 3 * wo:4 * wo].astype(hh_ref.dtype)


def wavelet_transform_2d(x: jax.Array):
    """Equivalent to WaveletTransform2D(inverse=False, 'haar', 'constant')(x).

    x: (B, C, H, W), float32 or bfloat16 (NCHW).
    Returns (LL, LH, HL, HH), each (B, C, Ho, Wo) in the input dtype.
    """
    b, c, h, w = x.shape
    if x.dtype in (jnp.bfloat16, jnp.float32):
        dt = x.dtype
    else:
        dt = jnp.float32
        x = x.astype(dt)
    itemsize = jnp.dtype(dt).itemsize

    # adaptive_pad, mode='constant' (zeros).  get_pad returns (padr, padl) with
    # the +1 for odd sizes on the first value; forward() unpacks it as
    # (padb, padt) / (padr, padl), so the extra sample lands on bottom / right —
    # exactly F.pad(data, [padl, padr, padt, padb]).
    padb, padt = _get_pad(h, FILTER_LEN)
    padr, padl = _get_pad(w, FILTER_LEN)
    hp = h + padt + padb
    wp = w + padl + padr
    ho, wo = hp // 2, wp // 2
    m = b * c * ho

    # Width tiling: single fused (2*Wp, 4*Wo) matrix while it is small; for
    # large widths exploit block-diagonality with a per-tile (2*TW, 2*TW)
    # matrix so MXU flops and the constant stay linear in W.
    if (2 * wp) * (2 * wp) * itemsize <= _ACT_VMEM_CAP:
        tw, pad_extra = wp, 0
    elif wp % 512 == 0:
        tw, pad_extra = 512, 0
    elif wp % 256 == 0:
        tw, pad_extra = 256, 0
    else:
        tw, pad_extra = 256, (-wp) % 256   # extra zero columns, sliced off below

    if padt or padb or padl or (padr + pad_extra):
        x = jnp.pad(x, ((0, 0), (0, 0), (padt, padb), (padl, padr + pad_extra)))
    wp_k = wp + pad_extra            # kernel-side (possibly tile-aligned) width
    n_wt = wp_k // tw                # width tiles
    wo_t = tw // 2                   # per-tile output width
    wo_k = wp_k // 2                 # kernel-side output width (>= wo)

    xr = x.reshape(m, 2 * wp_k)      # free, contiguous reshape (rows 2i | 2i+1)
    fmat = jnp.asarray(_fused_haar_matrix(tw, wo_t), dtype=dt)

    cap = _vmem_capacity_bytes()
    act_bytes = fmat.size * itemsize
    slab_budget = max(min(cap // 4, 16 * 1024 * 1024) - 2 * act_bytes,
                      2 * 1024 * 1024)
    tm = _pick_tm(m, tw, itemsize, slab_budget)
    n_m = -(-m // tm)

    f_spec = pl.BlockSpec((2 * tw, 4 * wo_t), lambda i, t: (0, 0))
    if n_wt == 1:
        x_args = (xr,)
        in_specs = [pl.BlockSpec((tm, 2 * wp_k), lambda i, t: (i, 0)), f_spec]
    else:
        # Same array passed twice; disjoint lane-block windows per width tile
        # (even rows: block t, odd rows: block t + n_wt) -> no duplicated HBM reads.
        x_args = (xr, xr)
        in_specs = [
            pl.BlockSpec((tm, tw), lambda i, t: (i, t)),
            pl.BlockSpec((tm, tw), lambda i, t, _o=n_wt: (i, t + _o)),
            f_spec,
        ]
    out_specs = tuple(pl.BlockSpec((tm, wo_t), lambda i, t: (i, t))
                      for _ in range(4))
    out_shape = tuple(jax.ShapeDtypeStruct((m, wo_k), dt) for _ in range(4))

    flops = 2 * m * (2 * tw) * (4 * wo_t) * n_wt
    bytes_accessed = itemsize * (m * 2 * wp_k + 4 * m * wo_k) + act_bytes

    needed = 4 * itemsize * tm * 2 * tw + 4 * tm * 2 * tw + 2 * act_bytes
    vmem_limit = int(min(0.7 * cap, max(2 * needed, 32 * 1024 * 1024)))

    outs = pl.pallas_call(
        _dwt_kernel,
        out_shape=out_shape,
        grid=(n_m, n_wt),
        in_specs=in_specs,
        out_specs=out_specs,
        compiler_params=pltpu.CompilerParams(
            dimension_semantics=("parallel", "parallel"),
            vmem_limit_bytes=vmem_limit,
        ),
        cost_estimate=pl.CostEstimate(
            flops=int(flops), transcendentals=0,
            bytes_accessed=int(bytes_accessed)),
    )(*x_args, fmat)

    res = []
    for sub in outs:
        if wo_k != wo:
            sub = sub[:, :wo]        # drop tile-alignment columns (zeros)
        res.append(sub.reshape(b, c, ho, wo))
    return tuple(res)                # (LL, LH, HL, HH) — module order


# ---------------------------------------------------------------------------
# Pure-numpy reference mirroring the PyTorch module (haar, K=2, constant pad).
# ---------------------------------------------------------------------------
def _reference_dwt(x: np.ndarray):
    b, c, h, w = x.shape
    padb, padt = _get_pad(h, FILTER_LEN)
    padr, padl = _get_pad(w, FILTER_LEN)
    xp = np.pad(x.astype(np.float32),
                ((0, 0), (0, 0), (padt, padb), (padl, padr)))
    hp, wp = xp.shape[-2:]
    ho, wo = hp // 2, wp // 2
    xr = xp.reshape(b, c, ho, 2, wo, 2)
    outs = []
    for fh, fw in ((DEC_LO, DEC_LO), (DEC_HI, DEC_LO),
                   (DEC_LO, DEC_HI), (DEC_HI, DEC_HI)):
        filt = np.outer(fh, fw).astype(np.float32)   # rows = height, cols = width
        outs.append(np.einsum('bchpwq,pq->bchw', xr, filt))
    return outs


if __name__ == "__main__":
    k1, k2, k3 = jax.random.split(jax.random.PRNGKey(0), 3)

    # 1) Primary small shape, float32.
    x1 = jax.random.normal(k1, (2, 4, 16, 16), dtype=jnp.float32)
    outs1 = wavelet_transform_2d(x1)
    jax.block_until_ready(outs1)
    for got, want in zip(outs1, _reference_dwt(np.asarray(x1))):
        assert got.shape == want.shape, (got.shape, want.shape)
        np.testing.assert_allclose(np.asarray(got), want, rtol=1e-5, atol=1e-5)

    # 2) Odd spatial dims (exercises the constant bottom/right padding path).
    x2 = jax.random.normal(k2, (2, 3, 17, 23), dtype=jnp.float32)
    outs2 = wavelet_transform_2d(x2)
    jax.block_until_ready(outs2)
    for got, want in zip(outs2, _reference_dwt(np.asarray(x2))):
        assert got.shape == want.shape, (got.shape, want.shape)
        np.testing.assert_allclose(np.asarray(got), want, rtol=1e-5, atol=1e-5)

    # 3) Wide input -> width-tiled path (block-diagonal per-tile matrix).
    x3 = jax.random.normal(k3, (1, 2, 8, 1536), dtype=jnp.float32)
    outs3 = wavelet_transform_2d(x3)
    jax.block_until_ready(outs3)
    for got, want in zip(outs3, _reference_dwt(np.asarray(x3))):
        assert got.shape == want.shape, (got.shape, want.shape)
        np.testing.assert_allclose(np.asarray(got), want, rtol=1e-5, atol=1e-5)

    # 4) bf16 end-to-end (bf16 DMA + MXU, f32 accumulation, bf16 outputs).
    xb = x1.astype(jnp.bfloat16)
    outsb = wavelet_transform_2d(xb)
    jax.block_until_ready(outsb)
    refb = _reference_dwt(np.asarray(xb).astype(np.float32))
    for got, want in zip(outsb, refb):
        assert got.dtype == jnp.bfloat16
        np.testing.assert_allclose(np.asarray(got).astype(np.float32), want,
                                   rtol=2e-2, atol=2e-2)

    print("KERNEL_OK")
</pallas_src>

<mosaic_0001>
module attributes {stable_mosaic.version = 11 : i64} {
  func.func @_dwt_kernel(%arg0: i32, %arg1: i32, %arg2: memref<8x32xf32, #tpu.memory_space<vmem>>, %arg3: memref<32x32xf32, #tpu.memory_space<vmem>>, %arg4: memref<8x8xf32, #tpu.memory_space<vmem>>, %arg5: memref<8x8xf32, #tpu.memory_space<vmem>>, %arg6: memref<8x8xf32, #tpu.memory_space<vmem>>, %arg7: memref<8x8xf32, #tpu.memory_space<vmem>>) attributes {dimension_semantics = [#tpu.dimension_semantics<parallel>, #tpu.dimension_semantics<parallel>], iteration_bounds = array<i64: 8, 1>, scalar_prefetch = 0 : i64, scratch_operands = 0 : i64, tpu.core_type = #tpu.core_type<tc>, window_params = [{transform_indices = @transform_0, window_bounds = array<i64: 8, 32>}, {pipeline_mode = #tpu.pipeline_mode<synchronous>, transform_indices = @transform_1, window_bounds = array<i64: 32, 32>}, {transform_indices = @transform_2, window_bounds = array<i64: 8, 8>}, {transform_indices = @transform_3, window_bounds = array<i64: 8, 8>}, {transform_indices = @transform_4, window_bounds = array<i64: 8, 8>}, {transform_indices = @transform_5, window_bounds = array<i64: 8, 8>}]} {
    %c0 = arith.constant 0 : index
    %c0_0 = arith.constant 0 : index
    %0 = vector.load %arg2[%c0, %c0_0] : memref<8x32xf32, #tpu.memory_space<vmem>>, vector<8x32xf32>
    %c0_1 = arith.constant 0 : index
    %c0_2 = arith.constant 0 : index
    %1 = vector.load %arg3[%c0_1, %c0_2] : memref<32x32xf32, #tpu.memory_space<vmem>>, vector<32x32xf32>
    %cst = arith.constant dense<0.000000e+00> : vector<8x32xf32>
    %2 = tpu.matmul %0, %1, %cst {dimension_numbers = #tpu.dot_dimension_numbers<[1], [0], [0], [1], [0, 0, 1, 1], [], []>} : vector<8x32xf32>, vector<32x32xf32>, vector<8x32xf32> -> vector<8x32xf32>
    %3 = vector.extract_strided_slice %2 {offsets = [0, 0], sizes = [8, 8], strides = [1, 1]} : vector<8x32xf32> to vector<8x8xf32>
    %c0_3 = arith.constant 0 : index
    %c0_4 = arith.constant 0 : index
    %4 = vector.load %arg4[%c0_3, %c0_4] : memref<8x8xf32, #tpu.memory_space<vmem>>, vector<8x8xf32>
    tpu.vector_store %arg4[%c0_3, %c0_4], %3 {strides = array<i32>} : memref<8x8xf32, #tpu.memory_space<vmem>>, vector<8x8xf32>,
    %5 = vector.extract_strided_slice %2 {offsets = [0, 8], sizes = [8, 8], strides = [1, 1]} : vector<8x32xf32> to vector<8x8xf32>
    %c0_5 = arith.constant 0 : index
    %c0_6 = arith.constant 0 : index
    %6 = vector.load %arg5[%c0_5, %c0_6] : memref<8x8xf32, #tpu.memory_space<vmem>>, vector<8x8xf32>
    tpu.vector_store %arg5[%c0_5, %c0_6], %5 {strides = array<i32>} : memref<8x8xf32, #tpu.memory_space<vmem>>, vector<8x8xf32>,
    %7 = vector.extract_strided_slice %2 {offsets = [0, 16], sizes = [8, 8], strides = [1, 1]} : vector<8x32xf32> to vector<8x8xf32>
    %c0_7 = arith.constant 0 : index
    %c0_8 = arith.constant 0 : index
    %8 = vector.load %arg6[%c0_7, %c0_8] : memref<8x8xf32, #tpu.memory_space<vmem>>, vector<8x8xf32>
    tpu.vector_store %arg6[%c0_7, %c0_8], %7 {strides = array<i32>} : memref<8x8xf32, #tpu.memory_space<vmem>>, vector<8x8xf32>,
    %9 = vector.extract_strided_slice %2 {offsets = [0, 24], sizes = [8, 8], strides = [1, 1]} : vector<8x32xf32> to vector<8x8xf32>
    %c0_9 = arith.constant 0 : index
    %c0_10 = arith.constant 0 : index
    %10 = vector.load %arg7[%c0_9, %c0_10] : memref<8x8xf32, #tpu.memory_space<vmem>>, vector<8x8xf32>
    tpu.vector_store %arg7[%c0_9, %c0_10], %9 {strides = array<i32>} : memref<8x8xf32, #tpu.memory_space<vmem>>, vector<8x8xf32>,
    return
  }
  func.func @transform_0(%arg0: i32, %arg1: i32) -> (i32, i32) {
    %c0_i32 = arith.constant 0 : i32
    %c0_i32_0 = arith.constant 0 : i32
    return %arg0, %c0_i32 : i32, i32
  }
  func.func @transform_1(%arg0: i32, %arg1: i32) -> (i32, i32) {
    %c0_i32 = arith.constant 0 : i32
    %c0_i32_0 = arith.constant 0 : i32
    %c0_i32_1 = arith.constant 0 : i32
    return %c0_i32, %c0_i32_0 : i32, i32
  }
  func.func @transform_2(%arg0: i32, %arg1: i32) -> (i32, i32) {
    %c0_i32 = arith.constant 0 : i32
    return %arg0, %arg1 : i32, i32
  }
  func.func @transform_3(%arg0: i32, %arg1: i32) -> (i32, i32) {
    %c0_i32 = arith.constant 0 : i32
    return %arg0, %arg1 : i32, i32
  }
  func.func @transform_4(%arg0: i32, %arg1: i32) -> (i32, i32) {
    %c0_i32 = arith.constant 0 : i32
    return %arg0, %arg1 : i32, i32
  }
  func.func @transform_5(%arg0: i32, %arg1: i32) -> (i32, i32) {
    %c0_i32 = arith.constant 0 : i32
    return %arg0, %arg1 : i32, i32
  }
}

</mosaic_0001>

<bundles_post_ra>
// kernel: tpu_custom_call.1
= control target key start
LH: loop header
LB: loop body
LE: loop exit
PB: predicated region body
PF: predicated region fallthrough
CT: control target
= control target key end

     0   :  { %s630_s18 = smov 0   ;;  %s632_s19 = smov 0   ;;  %s688_s0 = inlined_call_operand.vmem [shape: f32[64,32], index: 0, kind: input, shape index: {}]   ;;  %s689_s1 = inlined_call_operand.vmem [shape: f32[32,32], index: 1, kind: input, shape index: {}]   ;;  %s690_s2 = inlined_call_operand.vmem [shape: f32[64,8], index: 2, kind: output, shape index: {0}]   ;;  %s691_s3 = inlined_call_operand.vmem [shape: f32[64,8], index: 3, kind: output, shape index: {1}]   ;;  %s692_s4 = inlined_call_operand.vmem [shape: f32[64,8], index: 4, kind: output, shape index: {2}]   ;;  %s693_s5 = inlined_call_operand.vmem [shape: f32[64,8], index: 5, kind: output, shape index: {3}]  }
   0x1   :  { %s634_s20 = smov 0  }
   0x2 LB: > { %s28_s21 = sadd.s32 1, %s591_s19  ;;  %p537_p0 = scmp.ge.s32.totalorder %s595_s20, 1  ;;  %s595_s20 = sphi %s634_s20, %s16_s20   ;;  %s591_s19 = sphi %s632_s19, %s695_s19   ;;  %s587_s18 = sphi %s630_s18, %s694_s18  }
   0x3   : > { %p30_p1 = scmp.ge.s32.totalorder %s28_s21, 8  ;;  %p213_p2 = scmp.lt.s32.totalorder %s595_s20, 9 }
   0x5   : > { %s697_s21 = smov (%p30_p1, %s28_s21), 0  ;;  %p214_p3 = pnand %p537_p0, %p213_p2 }
   0x6   : > { %p263_p4 = scmp.lt.s32.totalorder (!%p214_p3), %s587_s18, 7  ;;  %s597_s12 = smov (!%p214_p3), 104  }
   0x7   : > { %217 = sbr.rel (%p214_p3) target bundleno = 270 (0x10e), region = 28  ;;  %s598_s13 = smov (!%p214_p3), 120  }
   0x8   : > { %s599_s14 = smov (!%p214_p3), 112  }
   0xc   : > { %v299_v0 = vld [vmem:[%s689_s1 + $0x18] sm:$0xff]  ;;  %v298_v1 = vld [vmem:[%s689_s1 + $0x10] sm:$0xff]  ;;  %v297_v2 = vld [vmem:[%s689_s1 + $0x8] sm:$0xff]  ;;  %s699_s18 = smov (!%p263_p4, %s587_s18), 7  ;;  %vm300_vm0 = vcmask 261120   ;;  %vm324_vm1 = vcmask 64512  }
   0xd   : > { %316 = vmatpush.msra.mxu0 %v299_v0  ;;  %v296_v3 = vld [vmem:[%s689_s1] sm:$0xff]  ;;  %s538_s30 = sshll.u32 %s699_s18, 3 }
   0xe   : > { %s266_s8 = scalar_lea.vmem %s688_s0, %s538_s30  ;;  %s273_s11 = scalar_lea.vmem %s690_s2, %s538_s30 }
   0xf   : > { %317 = vmatpush.msra.mxu0 %v298_v1  ;;  %v295_v4 = vld [vmem:[%s266_s8] sm:$0xff]  ;;  %s294_s17 = scalar_lea.vmem %s693_s5, %s538_s30  ;;  %s280_s23 = scalar_lea.vmem %s691_s3, %s538_s30 }
  0x10   : > { %s287_s26 = scalar_lea.vmem %s692_s4, %s538_s30 }
  0x11   : > { %318 = vmatpush.msra.mxu0 %v297_v2 }
  0x13   : > { %319 = vmatpush.msra.mxu0 %v296_v3 }
  0x14   : > { %543 = vmatmul.msk.f32.vlgmr.msra.gmra.mxu0 %vm300_vm0, %v295_v4 }
  0x91   : > { %v321_v5 = vpop.f32.mrf.mxu0 }
  0x92   : > { %325 = vst.msk [vmem:[%s273_s11] sm:$0xff] %vm324_vm1, %v321_v5  ;;  %335 = vrot.lane.b32.xlu1 %v321_v5, %s597_s12  ;;  %327 = vrot.lane.b32.xlu0 %v321_v5, %s598_s13 }
  0x9a   : > { %331 = vrot.lane.b32.xlu0 %v321_v5, %s599_s14 }
 0x104   : > { %v336_v6 = vpop.permute.xlu1 %335  ;;  %v328_v7 = vpop.permute.xlu0 %327 }
 0x105   : > { %338 = vst.msk [vmem:[%s294_s17] sm:$0xff] %vm324_vm1, %v336_v6 }
 0x106   : > { %330 = vst.msk [vmem:[%s280_s23] sm:$0xff] %vm324_vm1, %v328_v7 }
 0x10c   : > { %v332_v8 = vpop.permute.xlu0 %331 }
 0x10d   : > { %334 = vst.msk [vmem:[%s287_s26] sm:$0xff] %vm324_vm1, %v332_v8 }
 0x10e PF: > { %s16_s20 = sadd.s32 1, %s595_s20   ;;  %s694_s18 = smov %s591_s19 }
 0x10f   : > { %p13_p5 = scmp.ge.s32.totalorder %s16_s20, 10   ;;  %s695_s19 = smov %s697_s21 }
 0x111   :  { %15 = sbr.rel (!%p13_p5) target bundleno = 2 (0x2), region = 94 }

</bundles_post_ra>
